<compile_context>
chip_gen: v5e
topology: v5e:2x2
jax: 0.10.0
libtpu: 0.0.40
codegen_flags: <defaults>
</compile_context>

<pallas_src>
import functools
import math

import jax
import jax.numpy as jnp
from jax import lax
from jax.experimental import pallas as pl
from jax.experimental.pallas import tpu as pltpu


# ----------------------------------------------------------------------------
# Generation-aware VMEM budget (v7x: 64 MiB/TC -> ~48 MiB; v5e/v6e: 128 MiB -> ~96 MiB)
# ----------------------------------------------------------------------------
@functools.lru_cache(maxsize=None)
def _vmem_limit():
    try:
        info = pltpu.get_tpu_info()
        cap = int(getattr(info, "vmem_capacity_bytes", 0) or 0)
        if cap > 0:
            return (cap * 3) // 4
    except Exception:
        pass
    return 48 * 1024 * 1024   # conservative fallback (fits every generation)


def _tile(dim, pref, align):
    """Largest divisor of `dim` that is <= pref and a multiple of `align`.

    Falls back to the full dimension (always layout-legal) when no aligned
    divisor exists.  # TODO(synk): pad + mask the edge tile for pathological
    shapes where the full-dim fallback would exceed the VMEM budget.
    """
    if dim <= pref:
        return dim
    t = (pref // align) * align
    while t >= align:
        if dim % t == 0:
            return t
        t -= align
    return dim


# ----------------------------------------------------------------------------
# Kernel 1: fused Q/K/V projection  y[p] = x[p] @ W[p]^T + b[p],  p = 0,1,2
#   grid = (3, M/tm, N/tn, K/tk); K-axis accumulated in a f32 VMEM scratch.
#   Operands arrive in bf16 (cast once in the wrapper); output is bf16.
# ----------------------------------------------------------------------------
def qkv_proj_kernel(x_ref, w_ref, b_ref, o_ref, acc_ref):
    k = pl.program_id(3)

    @pl.when(k == 0)
    def _init():
        acc_ref[...] = jnp.zeros_like(acc_ref)

    acc_ref[...] += jnp.dot(x_ref[0], w_ref[0], preferred_element_type=jnp.float32)

    @pl.when(k == pl.num_programs(3) - 1)
    def _finalize():
        # bias applied once, after the K reduction (keeps the inner loop MXU-only)
        o_ref[0] = (acc_ref[...] + b_ref[0]).astype(o_ref.dtype)


def qkv_proj_pallas(x_stack, w_stack, b_stack, *, tm_pref=512, tn_pref=512, tk_pref=512):
    P, M, K = x_stack.shape
    N = w_stack.shape[2]
    tm = _tile(M, tm_pref, 8)
    tn = _tile(N, tn_pref, 128)
    tk = _tile(K, tk_pref, 128)
    grid = (P, M // tm, N // tn, K // tk)
    return pl.pallas_call(
        qkv_proj_kernel,
        out_shape=jax.ShapeDtypeStruct((P, M, N), jnp.bfloat16),
        grid=grid,
        in_specs=[
            pl.BlockSpec((1, tm, tk), lambda p, i, j, k: (p, i, k)),
            pl.BlockSpec((1, tk, tn), lambda p, i, j, k: (p, k, j)),
            pl.BlockSpec((1, 1, tn), lambda p, i, j, k: (p, 0, j)),
        ],
        out_specs=pl.BlockSpec((1, tm, tn), lambda p, i, j, k: (p, i, j)),
        scratch_shapes=[pltpu.VMEM((tm, tn), jnp.float32)],
        compiler_params=pltpu.CompilerParams(
            dimension_semantics=("parallel", "parallel", "parallel", "arbitrary"),
            vmem_limit_bytes=_vmem_limit(),
        ),
    )(x_stack, w_stack, b_stack)


# ----------------------------------------------------------------------------
# Kernel 2: scaled dot-product attention, a BLOCK of heads per grid step.
#   1/sqrt(d) is already folded into the Q projection; softmax divide is an
#   approx EUP reciprocal; MXU operands and the output are bf16.
# ----------------------------------------------------------------------------
def attn_kernel(q_ref, k_ref, v_ref, o_ref):
    q = q_ref[...]                       # bf16; scale folded into W_q / b_q
    k = k_ref[...]
    s = jnp.einsum("hqd,hkd->hqk", q, k, preferred_element_type=jnp.float32)
    m = jnp.max(s, axis=-1, keepdims=True)
    # TODO(synk): on v6e/v7x with small d the exp can be done in bf16 (EUP 2x);
    #             kept f32 here for v5e portability and accuracy.
    p = jnp.exp(s - m)
    inv = pl.reciprocal(jnp.sum(p, axis=-1, keepdims=True), approx=True)  # EUP slot
    p = (p * inv).astype(jnp.bfloat16)
    o_ref[...] = jnp.einsum(
        "hqk,hkd->hqd", p, v_ref[...], preferred_element_type=jnp.float32
    ).astype(o_ref.dtype)


def _head_block(bh, s, d, budget_bytes):
    """Largest divisor of BH that fits the VMEM budget and leaves >= 2 grid steps.

    Accounts for BlockSpec double-buffering of the bf16 q/k/v/o tiles plus the
    f32 score block, its exp, and the bf16 P copy.
    """
    per_head = 2 * (4 * s * d * 2) + s * s * (4 + 4 + 2)
    cap = bh if bh < 2 else bh // 2        # >= 2 grid steps: pipelining + megacore
    hb = 1
    for cand in range(1, cap + 1):
        if bh % cand == 0 and cand * per_head <= budget_bytes:
            hb = cand
    return hb


def attention_pallas(qh, kh, vh):
    BH, S, d = qh.shape
    limit = _vmem_limit()
    hb = _head_block(BH, S, d, budget_bytes=limit // 4)
    # TODO(synk): for long S switch to a flash-style online-softmax over KV tiles
    #             (O(tq*tk) VMEM) and repack the d<128 output lane-dense; the
    #             module's flat head-split reshape makes the lane-dense repack a
    #             real transpose in the wrapper, so it is deferred here.
    return pl.pallas_call(
        attn_kernel,
        out_shape=jax.ShapeDtypeStruct((BH, S, d), jnp.bfloat16),
        grid=(BH // hb,),
        in_specs=[
            pl.BlockSpec((hb, S, d), lambda h: (h, 0, 0)),
            pl.BlockSpec((hb, S, d), lambda h: (h, 0, 0)),
            pl.BlockSpec((hb, S, d), lambda h: (h, 0, 0)),
        ],
        out_specs=pl.BlockSpec((hb, S, d), lambda h: (h, 0, 0)),
        compiler_params=pltpu.CompilerParams(
            dimension_semantics=("parallel",),
            vmem_limit_bytes=limit,
        ),
    )(qh, kh, vh)


# ----------------------------------------------------------------------------
# Kernel 3: final linear + residual(V) + LayerNorm (ResandNorm), fused & tiled.
#   grid = (M/tm, K/tk); K accumulated; LN needs the full D row so N is untiled.
#   When the full bf16 weight fits the budget, tk = K (single K step) and the
#   k-constant block index keeps the weight resident in VMEM.
# ----------------------------------------------------------------------------
def final_kernel(x_ref, res_ref, w_ref, b_ref, g_ref, beta_ref, o_ref, acc_ref):
    k = pl.program_id(1)

    @pl.when(k == 0)
    def _init():
        acc_ref[...] = jnp.zeros_like(acc_ref)

    acc_ref[...] += jnp.dot(x_ref[...], w_ref[...], preferred_element_type=jnp.float32)

    @pl.when(k == pl.num_programs(1) - 1)
    def _finalize():
        z = acc_ref[...] + b_ref[...] + res_ref[...]        # residual is V (f32)
        mean = jnp.mean(z, axis=-1, keepdims=True)
        zc = z - mean
        var = jnp.mean(zc * zc, axis=-1, keepdims=True)     # biased, like nn.LayerNorm
        inv = lax.rsqrt(var + 1e-5)
        o_ref[...] = (zc * inv * g_ref[...] + beta_ref[...]).astype(o_ref.dtype)


def final_pallas(att2d, res2d, wf_t, bf_row, gamma_row, beta_row,
                 *, tm_pref=512, tk_pref=512):
    M, K = att2d.shape
    D = wf_t.shape[1]
    limit = _vmem_limit()
    tm = _tile(M, tm_pref, 8)
    # Full-weight residency when the bf16 weight (double-buffer-conservative)
    # fits comfortably; otherwise tile + accumulate K.
    if K * D * 2 * 2 <= limit // 3:
        tk = K
    else:
        tk = _tile(K, tk_pref, 128)
    grid = (M // tm, K // tk)
    return pl.pallas_call(
        final_kernel,
        out_shape=jax.ShapeDtypeStruct((M, D), jnp.float32),
        grid=grid,
        in_specs=[
            pl.BlockSpec((tm, tk), lambda i, k: (i, k)),
            pl.BlockSpec((tm, D), lambda i, k: (i, 0)),     # fetched once per i (k-constant)
            pl.BlockSpec((tk, D), lambda i, k: (k, 0)),     # resident when tk == K
            pl.BlockSpec((1, D), lambda i, k: (0, 0)),
            pl.BlockSpec((1, D), lambda i, k: (0, 0)),
            pl.BlockSpec((1, D), lambda i, k: (0, 0)),
        ],
        out_specs=pl.BlockSpec((tm, D), lambda i, k: (i, 0)),
        scratch_shapes=[pltpu.VMEM((tm, D), jnp.float32)],
        compiler_params=pltpu.CompilerParams(
            dimension_semantics=("parallel", "arbitrary"),
            vmem_limit_bytes=limit,
        ),
    )(att2d, res2d, wf_t, bf_row, gamma_row, beta_row)


# ----------------------------------------------------------------------------
# Full module forward (glue = stack/reshape only; compute is in the kernels)
# ----------------------------------------------------------------------------
@functools.partial(jax.jit, static_argnames=("headnum",))
def multihead_attention(Q, K, V, prep, headnum):
    B, S, D = Q.shape
    d = D // headnum
    M = B * S

    # One fused projection call: stacked bf16 activations, bf16 pre-packed weights.
    x_stack = jnp.stack(
        [Q.reshape(M, D), K.reshape(M, D), V.reshape(M, D)]).astype(jnp.bfloat16)
    qkv = qkv_proj_pallas(x_stack, prep["w_qkv_t"], prep["b_qkv"])   # (3, M, D) bf16

    # Exactly the module's view(batch*h, -1, dimperhead) (row-major reshape, free in XLA).
    Qh = qkv[0].reshape(B * headnum, -1, d)
    Kh = qkv[1].reshape(B * headnum, -1, d)
    Vh = qkv[2].reshape(B * headnum, -1, d)

    att = attention_pallas(Qh, Kh, Vh)            # (B*h, S, d) bf16
    att2d = att.reshape(M, D)                     # same flat buffer as view(B,-1,d*h)

    # TODO(synk): nn.Dropout layers are identity here (inference semantics).
    out2d = final_pallas(
        att2d, V.reshape(M, D),
        prep["wf_t"], prep["bf"], prep["ln_g"], prep["ln_b"],
    )
    return out2d.reshape(B, S, D)


# ----------------------------------------------------------------------------
# Parameters: raw nn.Linear-style params (for the fp32 reference) and a one-time
# kernel-side packing (transpose, stack, scale folding, bf16 casts).
# ----------------------------------------------------------------------------
def init_params(key, modeldim):
    bound = 1.0 / (modeldim ** 0.5)
    ks = jax.random.split(key, 8)

    def lin(kw, kb):
        w = jax.random.uniform(kw, (modeldim, modeldim), jnp.float32, -bound, bound)
        b = jax.random.uniform(kb, (modeldim,), jnp.float32, -bound, bound)
        return w, b

    wq, bq = lin(ks[0], ks[1])
    wk, bk = lin(ks[2], ks[3])
    wv, bv = lin(ks[4], ks[5])
    wf, bf = lin(ks[6], ks[7])
    return {
        "wq": wq, "bq": bq, "wk": wk, "bk": bk, "wv": wv, "bv": bv,
        "wf": wf, "bf": bf,
        "ln_g": jnp.ones((modeldim,), jnp.float32),   # LayerNorm default init
        "ln_b": jnp.zeros((modeldim,), jnp.float32),
    }


def prepare_params(params, headnum):
    """Pack params for the kernels: pre-transpose (y = x @ W^T), stack Q/K/V,
    fold 1/sqrt(dimperhead) into the Q projection, and cast matmul weights to bf16."""
    D = params["wq"].shape[0]
    scale = 1.0 / math.sqrt(D // headnum)
    w_qkv_t = jnp.stack(
        [params["wq"].T * scale, params["wk"].T, params["wv"].T]).astype(jnp.bfloat16)
    b_qkv = jnp.stack(
        [params["bq"] * scale, params["bk"], params["bv"]]).reshape(3, 1, D)
    return {
        "w_qkv_t": w_qkv_t,                               # (3, D, D) bf16
        "b_qkv": b_qkv.astype(jnp.float32),               # (3, 1, D) f32
        "wf_t": params["wf"].T.astype(jnp.bfloat16),      # (D, D) bf16
        "bf": params["bf"].reshape(1, D),
        "ln_g": params["ln_g"].reshape(1, D),
        "ln_b": params["ln_b"].reshape(1, D),
    }


# ----------------------------------------------------------------------------
# Pure-JAX fp32 reference (mirrors the PyTorch forward) for verification
# ----------------------------------------------------------------------------
def reference(Q, K, V, params, headnum):
    B, S, D = Q.shape
    d = D // headnum
    Qc = Q.reshape(B * S, D) @ params["wq"].T + params["bq"]
    Kc = K.reshape(B * S, D) @ params["wk"].T + params["bk"]
    Vc = V.reshape(B * S, D) @ params["wv"].T + params["bv"]
    Qh = Qc.reshape(B * headnum, -1, d)
    Kh = Kc.reshape(B * headnum, -1, d)
    Vh = Vc.reshape(B * headnum, -1, d)
    s = jnp.einsum("bqd,bkd->bqk", Qh, Kh) / jnp.sqrt(jnp.float32(d))
    p = jax.nn.softmax(s, axis=-1)
    att = jnp.einsum("bqk,bkd->bqd", p, Vh)
    y = att.reshape(B * S, D) @ params["wf"].T + params["bf"]
    z = y.reshape(B, S, D) + V
    mean = jnp.mean(z, axis=-1, keepdims=True)
    var = jnp.mean((z - mean) ** 2, axis=-1, keepdims=True)
    return (z - mean) / jnp.sqrt(var + 1e-5) * params["ln_g"] + params["ln_b"]


if __name__ == "__main__":
    batch, seq, modeldim, headnum = 2, 8, 32, 8

    key = jax.random.PRNGKey(0)
    kq, kk, kv, kp = jax.random.split(key, 4)
    Q = jax.random.normal(kq, (batch, seq, modeldim), jnp.float32)
    K = jax.random.normal(kk, (batch, seq, modeldim), jnp.float32)
    V = jax.random.normal(kv, (batch, seq, modeldim), jnp.float32)
    params = init_params(kp, modeldim)
    prep = prepare_params(params, headnum)

    out = multihead_attention(Q, K, V, prep, headnum=headnum)
    out = jax.block_until_ready(out)

    ref = reference(Q, K, V, params, headnum)
    assert out.shape == (batch, seq, modeldim)
    # bf16 weights/activations/intermediates (f32 accumulation) + approx reciprocal
    # -> tolerance loosened vs the fp32 reference (inference-grade accuracy).
    assert jnp.allclose(out, ref, atol=8e-2, rtol=8e-2), "mismatch vs JAX reference"

    print("KERNEL_OK")
</pallas_src>

<mosaic_0001>
module attributes {stable_mosaic.version = 11 : i64} {
  func.func @qkv_proj_kernel(%arg0: i32, %arg1: i32, %arg2: i32, %arg3: i32, %arg4: memref<1x16x32xbf16, #tpu.memory_space<vmem>>, %arg5: memref<1x32x32xbf16, #tpu.memory_space<vmem>>, %arg6: memref<1x1x32xf32, #tpu.memory_space<vmem>>, %arg7: memref<1x16x32xbf16, #tpu.memory_space<vmem>>, %arg8: memref<16x32xf32, #tpu.memory_space<vmem>>) attributes {dimension_semantics = [#tpu.dimension_semantics<parallel>, #tpu.dimension_semantics<parallel>, #tpu.dimension_semantics<parallel>, #tpu.dimension_semantics<arbitrary>], iteration_bounds = array<i64: 3, 1, 1, 1>, scalar_prefetch = 0 : i64, scratch_operands = 1 : i64, tpu.core_type = #tpu.core_type<tc>, window_params = [{transform_indices = @transform_0, window_bounds = array<i64: 1, 16, 32>}, {transform_indices = @transform_1, window_bounds = array<i64: 1, 32, 32>}, {transform_indices = @transform_2, window_bounds = array<i64: 1, 1, 32>}, {transform_indices = @transform_3, window_bounds = array<i64: 1, 16, 32>}]} {
    %c0_i32 = arith.constant 0 : i32
    %0 = arith.cmpi eq, %arg3, %c0_i32 : i32
    %1 = arith.extui %0 : i1 to i32
    %c0_i32_0 = arith.constant 0 : i32
    %2 = arith.cmpi ne, %1, %c0_i32_0 : i32
    scf.if %2 {
      %cst_12 = arith.constant 0.000000e+00 : f32
      %14 = vector.broadcast %cst_12 : f32 to vector<16x32xf32>
      %c0_13 = arith.constant 0 : index
      %c0_14 = arith.constant 0 : index
      %15 = vector.load %arg8[%c0_13, %c0_14] : memref<16x32xf32, #tpu.memory_space<vmem>>, vector<16x32xf32>
      tpu.vector_store %arg8[%c0_13, %c0_14], %14 {strides = array<i32>} : memref<16x32xf32, #tpu.memory_space<vmem>>, vector<16x32xf32>,
    } else {
    }
    %c0 = arith.constant 0 : index
    %c0_1 = arith.constant 0 : index
    %3 = vector.load %arg8[%c0, %c0_1] : memref<16x32xf32, #tpu.memory_space<vmem>>, vector<16x32xf32>
    %c0_2 = arith.constant 0 : index
    %c0_3 = arith.constant 0 : index
    %c0_4 = arith.constant 0 : index
    %4 = vector.load %arg4[%c0_2, %c0_3, %c0_4] : memref<1x16x32xbf16, #tpu.memory_space<vmem>>, vector<1x16x32xbf16>
    %5 = vector.shape_cast %4 : vector<1x16x32xbf16> to vector<16x32xbf16>
    %c0_5 = arith.constant 0 : index
    %c0_6 = arith.constant 0 : index
    %c0_7 = arith.constant 0 : index
    %6 = vector.load %arg5[%c0_5, %c0_6, %c0_7] : memref<1x32x32xbf16, #tpu.memory_space<vmem>>, vector<1x32x32xbf16>
    %7 = vector.shape_cast %6 : vector<1x32x32xbf16> to vector<32x32xbf16>
    %cst = arith.constant dense<0.000000e+00> : vector<16x32xf32>
    %8 = tpu.matmul %5, %7, %cst {dimension_numbers = #tpu.dot_dimension_numbers<[1], [0], [0], [1], [0, 0, 1, 1], [], []>} : vector<16x32xbf16>, vector<32x32xbf16>, vector<16x32xf32> -> vector<16x32xf32>
    %9 = arith.addf %3, %8 : vector<16x32xf32>
    %c0_8 = arith.constant 0 : index
    %c0_9 = arith.constant 0 : index
    %10 = vector.load %arg8[%c0_8, %c0_9] : memref<16x32xf32, #tpu.memory_space<vmem>>, vector<16x32xf32>
    tpu.vector_store %arg8[%c0_8, %c0_9], %9 {strides = array<i32>} : memref<16x32xf32, #tpu.memory_space<vmem>>, vector<16x32xf32>,
    %c0_i32_10 = arith.constant 0 : i32
    %11 = arith.cmpi eq, %arg3, %c0_i32_10 : i32
    %12 = arith.extui %11 : i1 to i32
    %c0_i32_11 = arith.constant 0 : i32
    %13 = arith.cmpi ne, %12, %c0_i32_11 : i32
    scf.if %13 {
      %c0_12 = arith.constant 0 : index
      %c0_13 = arith.constant 0 : index
      %14 = vector.load %arg8[%c0_12, %c0_13] : memref<16x32xf32, #tpu.memory_space<vmem>>, vector<16x32xf32>
      %c0_14 = arith.constant 0 : index
      %c0_15 = arith.constant 0 : index
      %c0_16 = arith.constant 0 : index
      %15 = vector.load %arg6[%c0_14, %c0_15, %c0_16] : memref<1x1x32xf32, #tpu.memory_space<vmem>>, vector<1x1x32xf32>
      %16 = vector.shape_cast %15 : vector<1x1x32xf32> to vector<1x32xf32>
      %17 = vector.broadcast %16 : vector<1x32xf32> to vector<16x32xf32>
      %18 = arith.addf %14, %17 : vector<16x32xf32>
      %19 = arith.truncf %18 : vector<16x32xf32> to vector<16x32xbf16>
      %c0_17 = arith.constant 0 : index
      %c0_18 = arith.constant 0 : index
      %c0_19 = arith.constant 0 : index
      %20 = vector.load %arg7[%c0_17, %c0_18, %c0_19] : memref<1x16x32xbf16, #tpu.memory_space<vmem>>, vector<1x16x32xbf16>
      %21 = vector.shape_cast %20 : vector<1x16x32xbf16> to vector<16x32xbf16>
      %22 = vector.shape_cast %19 : vector<16x32xbf16> to vector<1x16x32xbf16>
      tpu.vector_store %arg7[%c0_17, %c0_18, %c0_19], %22 {strides = array<i32>} : memref<1x16x32xbf16, #tpu.memory_space<vmem>>, vector<1x16x32xbf16>,
    } else {
    }
    return
  }
  func.func @transform_0(%arg0: i32, %arg1: i32, %arg2: i32, %arg3: i32) -> (i32, i32, i32) {
    %c0_i32 = arith.constant 0 : i32
    return %arg0, %arg1, %arg3 : i32, i32, i32
  }
  func.func @transform_1(%arg0: i32, %arg1: i32, %arg2: i32, %arg3: i32) -> (i32, i32, i32) {
    %c0_i32 = arith.constant 0 : i32
    return %arg0, %arg3, %arg2 : i32, i32, i32
  }
  func.func @transform_2(%arg0: i32, %arg1: i32, %arg2: i32, %arg3: i32) -> (i32, i32, i32) {
    %c0_i32 = arith.constant 0 : i32
    %c0_i32_0 = arith.constant 0 : i32
    return %arg0, %c0_i32, %arg2 : i32, i32, i32
  }
  func.func @transform_3(%arg0: i32, %arg1: i32, %arg2: i32, %arg3: i32) -> (i32, i32, i32) {
    %c0_i32 = arith.constant 0 : i32
    return %arg0, %arg1, %arg2 : i32, i32, i32
  }
}

module attributes {stable_mosaic.version = 11 : i64} {
  func.func @attn_kernel(%arg0: i32, %arg1: memref<8x8x4xbf16, #tpu.memory_space<vmem>>, %arg2: memref<8x8x4xbf16, #tpu.memory_space<vmem>>, %arg3: memref<8x8x4xbf16, #tpu.memory_space<vmem>>, %arg4: memref<8x8x4xbf16, #tpu.memory_space<vmem>>) attributes {dimension_semantics = [#tpu.dimension_semantics<parallel>], iteration_bounds = array<i64: 2>, scalar_prefetch = 0 : i64, scratch_operands = 0 : i64, tpu.core_type = #tpu.core_type<tc>, window_params = [{transform_indices = @transform_0, window_bounds = array<i64: 8, 8, 4>}, {transform_indices = @transform_1, window_bounds = array<i64: 8, 8, 4>}, {transform_indices = @transform_2, window_bounds = array<i64: 8, 8, 4>}, {transform_indices = @transform_3, window_bounds = array<i64: 8, 8, 4>}]} {
    %c0 = arith.constant 0 : index
    %c0_0 = arith.constant 0 : index
    %c0_1 = arith.constant 0 : index
    %0 = vector.load %arg1[%c0, %c0_0, %c0_1] : memref<8x8x4xbf16, #tpu.memory_space<vmem>>, vector<8x8x4xbf16>
    %c0_2 = arith.constant 0 : index
    %c0_3 = arith.constant 0 : index
    %c0_4 = arith.constant 0 : index
    %1 = vector.load %arg2[%c0_2, %c0_3, %c0_4] : memref<8x8x4xbf16, #tpu.memory_space<vmem>>, vector<8x8x4xbf16>
    "tpu.trace_start"() <{level = 10 : i32, message = "hqd,hkd->hqk"}> : () -> ()
    %cst = arith.constant dense<0.000000e+00> : vector<8x8x8xf32>
    %2 = tpu.matmul %0, %1, %cst {dimension_numbers = #tpu.dot_dimension_numbers<[2], [2], [1], [1], [0, 0, 0, 1, 1, 1], [0], [0]>} : vector<8x8x4xbf16>, vector<8x8x4xbf16>, vector<8x8x8xf32> -> vector<8x8x8xf32>
    "tpu.trace_stop"() : () -> ()
    %cst_5 = arith.constant dense<0xFF800000> : vector<8x8xf32>
    %3 = vector.multi_reduction <maximumf>, %2, %cst_5 [2] : vector<8x8x8xf32> to vector<8x8xf32>
    %4 = vector.shape_cast %3 : vector<8x8xf32> to vector<8x8x1xf32>
    %5 = vector.broadcast %4 : vector<8x8x1xf32> to vector<8x8x8xf32>
    %6 = arith.subf %2, %5 : vector<8x8x8xf32>
    %7 = math.exp %6 : vector<8x8x8xf32>
    %cst_6 = arith.constant dense<0.000000e+00> : vector<8x8xf32>
    %8 = vector.multi_reduction <add>, %7, %cst_6 [2] : vector<8x8x8xf32> to vector<8x8xf32>
    %9 = vector.shape_cast %8 : vector<8x8xf32> to vector<8x8x1xf32>
    %10 = tpu.reciprocal %9 {approx = true} : vector<8x8x1xf32> -> vector<8x8x1xf32>
    %11 = vector.broadcast %10 : vector<8x8x1xf32> to vector<8x8x8xf32>
    %12 = arith.mulf %7, %11 : vector<8x8x8xf32>
    %13 = arith.truncf %12 : vector<8x8x8xf32> to vector<8x8x8xbf16>
    %c0_7 = arith.constant 0 : index
    %c0_8 = arith.constant 0 : index
    %c0_9 = arith.constant 0 : index
    %14 = vector.load %arg3[%c0_7, %c0_8, %c0_9] : memref<8x8x4xbf16, #tpu.memory_space<vmem>>, vector<8x8x4xbf16>
    "tpu.trace_start"() <{level = 10 : i32, message = "hqk,hkd->hqd"}> : () -> ()
    %cst_10 = arith.constant dense<0.000000e+00> : vector<8x8x4xf32>
    %15 = tpu.matmul %13, %14, %cst_10 {dimension_numbers = #tpu.dot_dimension_numbers<[2], [1], [1], [2], [0, 0, 0, 1, 1, 2], [0], [0]>} : vector<8x8x8xbf16>, vector<8x8x4xbf16>, vector<8x8x4xf32> -> vector<8x8x4xf32>
    "tpu.trace_stop"() : () -> ()
    %16 = arith.truncf %15 : vector<8x8x4xf32> to vector<8x8x4xbf16>
    %c0_11 = arith.constant 0 : index
    %c0_12 = arith.constant 0 : index
    %c0_13 = arith.constant 0 : index
    %17 = vector.load %arg4[%c0_11, %c0_12, %c0_13] : memref<8x8x4xbf16, #tpu.memory_space<vmem>>, vector<8x8x4xbf16>
    tpu.vector_store %arg4[%c0_11, %c0_12, %c0_13], %16 {strides = array<i32>} : memref<8x8x4xbf16, #tpu.memory_space<vmem>>, vector<8x8x4xbf16>,
    return
  }
  func.func @transform_0(%arg0: i32) -> (i32, i32, i32) {
    %c0_i32 = arith.constant 0 : i32
    %c0_i32_0 = arith.constant 0 : i32
    %c0_i32_1 = arith.constant 0 : i32
    return %arg0, %c0_i32, %c0_i32_0 : i32, i32, i32
  }
  func.func @transform_1(%arg0: i32) -> (i32, i32, i32) {
    %c0_i32 = arith.constant 0 : i32
    %c0_i32_0 = arith.constant 0 : i32
    %c0_i32_1 = arith.constant 0 : i32
    return %arg0, %c0_i32, %c0_i32_0 : i32, i32, i32
  }
  func.func @transform_2(%arg0: i32) -> (i32, i32, i32) {
    %c0_i32 = arith.constant 0 : i32
    %c0_i32_0 = arith.constant 0 : i32
    %c0_i32_1 = arith.constant 0 : i32
    return %arg0, %c0_i32, %c0_i32_0 : i32, i32, i32
  }
  func.func @transform_3(%arg0: i32) -> (i32, i32, i32) {
    %c0_i32 = arith.constant 0 : i32
    %c0_i32_0 = arith.constant 0 : i32
    %c0_i32_1 = arith.constant 0 : i32
    return %arg0, %c0_i32, %c0_i32_0 : i32, i32, i32
  }
}

module attributes {stable_mosaic.version = 11 : i64} {
  func.func @final_kernel(%arg0: i32, %arg1: i32, %arg2: memref<16x32xbf16, #tpu.memory_space<vmem>>, %arg3: memref<16x32xf32, #tpu.memory_space<vmem>>, %arg4: memref<32x32xbf16, #tpu.memory_space<vmem>>, %arg5: memref<1x32xf32, #tpu.memory_space<vmem>>, %arg6: memref<1x32xf32, #tpu.memory_space<vmem>>, %arg7: memref<1x32xf32, #tpu.memory_space<vmem>>, %arg8: memref<16x32xf32, #tpu.memory_space<vmem>>, %arg9: memref<16x32xf32, #tpu.memory_space<vmem>>) attributes {dimension_semantics = [#tpu.dimension_semantics<parallel>, #tpu.dimension_semantics<arbitrary>], iteration_bounds = array<i64: 1, 1>, scalar_prefetch = 0 : i64, scratch_operands = 1 : i64, tpu.core_type = #tpu.core_type<tc>, window_params = [{transform_indices = @transform_0, window_bounds = array<i64: 16, 32>}, {transform_indices = @transform_1, window_bounds = array<i64: 16, 32>}, {transform_indices = @transform_2, window_bounds = array<i64: 32, 32>}, {pipeline_mode = #tpu.pipeline_mode<synchronous>, transform_indices = @transform_3, window_bounds = array<i64: 1, 32>}, {pipeline_mode = #tpu.pipeline_mode<synchronous>, transform_indices = @transform_4, window_bounds = array<i64: 1, 32>}, {pipeline_mode = #tpu.pipeline_mode<synchronous>, transform_indices = @transform_5, window_bounds = array<i64: 1, 32>}, {transform_indices = @transform_6, window_bounds = array<i64: 16, 32>}]} {
    %c0_i32 = arith.constant 0 : i32
    %0 = arith.cmpi eq, %arg1, %c0_i32 : i32
    %1 = arith.extui %0 : i1 to i32
    %c0_i32_0 = arith.constant 0 : i32
    %2 = arith.cmpi ne, %1, %c0_i32_0 : i32
    scf.if %2 {
      %cst_10 = arith.constant 0.000000e+00 : f32
      %12 = vector.broadcast %cst_10 : f32 to vector<16x32xf32>
      %c0_11 = arith.constant 0 : index
      %c0_12 = arith.constant 0 : index
      %13 = vector.load %arg9[%c0_11, %c0_12] : memref<16x32xf32, #tpu.memory_space<vmem>>, vector<16x32xf32>
      tpu.vector_store %arg9[%c0_11, %c0_12], %12 {strides = array<i32>} : memref<16x32xf32, #tpu.memory_space<vmem>>, vector<16x32xf32>,
    } else {
    }
    %c0 = arith.constant 0 : index
    %c0_1 = arith.constant 0 : index
    %3 = vector.load %arg9[%c0, %c0_1] : memref<16x32xf32, #tpu.memory_space<vmem>>, vector<16x32xf32>
    %c0_2 = arith.constant 0 : index
    %c0_3 = arith.constant 0 : index
    %4 = vector.load %arg2[%c0_2, %c0_3] : memref<16x32xbf16, #tpu.memory_space<vmem>>, vector<16x32xbf16>
    %c0_4 = arith.constant 0 : index
    %c0_5 = arith.constant 0 : index
    %5 = vector.load %arg4[%c0_4, %c0_5] : memref<32x32xbf16, #tpu.memory_space<vmem>>, vector<32x32xbf16>
    %cst = arith.constant dense<0.000000e+00> : vector<16x32xf32>
    %6 = tpu.matmul %4, %5, %cst {dimension_numbers = #tpu.dot_dimension_numbers<[1], [0], [0], [1], [0, 0, 1, 1], [], []>} : vector<16x32xbf16>, vector<32x32xbf16>, vector<16x32xf32> -> vector<16x32xf32>
    %7 = arith.addf %3, %6 : vector<16x32xf32>
    %c0_6 = arith.constant 0 : index
    %c0_7 = arith.constant 0 : index
    %8 = vector.load %arg9[%c0_6, %c0_7] : memref<16x32xf32, #tpu.memory_space<vmem>>, vector<16x32xf32>
    tpu.vector_store %arg9[%c0_6, %c0_7], %7 {strides = array<i32>} : memref<16x32xf32, #tpu.memory_space<vmem>>, vector<16x32xf32>,
    %c0_i32_8 = arith.constant 0 : i32
    %9 = arith.cmpi eq, %arg1, %c0_i32_8 : i32
    %10 = arith.extui %9 : i1 to i32
    %c0_i32_9 = arith.constant 0 : i32
    %11 = arith.cmpi ne, %10, %c0_i32_9 : i32
    scf.if %11 {
      %c0_10 = arith.constant 0 : index
      %c0_11 = arith.constant 0 : index
      %12 = vector.load %arg9[%c0_10, %c0_11] : memref<16x32xf32, #tpu.memory_space<vmem>>, vector<16x32xf32>
      %c0_12 = arith.constant 0 : index
      %c0_13 = arith.constant 0 : index
      %13 = vector.load %arg5[%c0_12, %c0_13] : memref<1x32xf32, #tpu.memory_space<vmem>>, vector<1x32xf32>
      %14 = vector.broadcast %13 : vector<1x32xf32> to vector<16x32xf32>
      %15 = arith.addf %12, %14 : vector<16x32xf32>
      %c0_14 = arith.constant 0 : index
      %c0_15 = arith.constant 0 : index
      %16 = vector.load %arg3[%c0_14, %c0_15] : memref<16x32xf32, #tpu.memory_space<vmem>>, vector<16x32xf32>
      %17 = arith.addf %15, %16 : vector<16x32xf32>
      %cst_16 = arith.constant dense<0.000000e+00> : vector<16xf32>
      %18 = vector.multi_reduction <add>, %17, %cst_16 [1] : vector<16x32xf32> to vector<16xf32>
      %19 = vector.shape_cast %18 : vector<16xf32> to vector<16x1xf32>
      %cst_17 = arith.constant 3.200000e+01 : f32
      %20 = vector.broadcast %cst_17 : f32 to vector<16x1xf32>
      %21 = arith.divf %19, %20 : vector<16x1xf32>
      %22 = vector.broadcast %21 : vector<16x1xf32> to vector<16x32xf32>
      %23 = arith.subf %17, %22 : vector<16x32xf32>
      %24 = arith.mulf %23, %23 : vector<16x32xf32>
      %cst_18 = arith.constant dense<0.000000e+00> : vector<16xf32>
      %25 = vector.multi_reduction <add>, %24, %cst_18 [1] : vector<16x32xf32> to vector<16xf32>
      %26 = vector.shape_cast %25 : vector<16xf32> to vector<16x1xf32>
      %cst_19 = arith.constant 3.200000e+01 : f32
      %27 = vector.broadcast %cst_19 : f32 to vector<16x1xf32>
      %28 = arith.divf %26, %27 : vector<16x1xf32>
      %cst_20 = arith.constant 9.99999974E-6 : f32
      %29 = vector.broadcast %cst_20 : f32 to vector<16x1xf32>
      %30 = arith.addf %28, %29 : vector<16x1xf32>
      %31 = math.rsqrt %30 : vector<16x1xf32>
      %32 = vector.broadcast %31 : vector<16x1xf32> to vector<16x32xf32>
      %33 = arith.mulf %23, %32 : vector<16x32xf32>
      %c0_21 = arith.constant 0 : index
      %c0_22 = arith.constant 0 : index
      %34 = vector.load %arg6[%c0_21, %c0_22] : memref<1x32xf32, #tpu.memory_space<vmem>>, vector<1x32xf32>
      %35 = vector.broadcast %34 : vector<1x32xf32> to vector<16x32xf32>
      %36 = arith.mulf %33, %35 : vector<16x32xf32>
      %c0_23 = arith.constant 0 : index
      %c0_24 = arith.constant 0 : index
      %37 = vector.load %arg7[%c0_23, %c0_24] : memref<1x32xf32, #tpu.memory_space<vmem>>, vector<1x32xf32>
      %38 = vector.broadcast %37 : vector<1x32xf32> to vector<16x32xf32>
      %39 = arith.addf %36, %38 : vector<16x32xf32>
      %c0_25 = arith.constant 0 : index
      %c0_26 = arith.constant 0 : index
      %40 = vector.load %arg8[%c0_25, %c0_26] : memref<16x32xf32, #tpu.memory_space<vmem>>, vector<16x32xf32>
      tpu.vector_store %arg8[%c0_25, %c0_26], %39 {strides = array<i32>} : memref<16x32xf32, #tpu.memory_space<vmem>>, vector<16x32xf32>,
    } else {
    }
    return
  }
  func.func @transform_0(%arg0: i32, %arg1: i32) -> (i32, i32) {
    %c0_i32 = arith.constant 0 : i32
    return %arg0, %arg1 : i32, i32
  }
  func.func @transform_1(%arg0: i32, %arg1: i32) -> (i32, i32) {
    %c0_i32 = arith.constant 0 : i32
    %c0_i32_0 = arith.constant 0 : i32
    return %arg0, %c0_i32 : i32, i32
  }
  func.func @transform_2(%arg0: i32, %arg1: i32) -> (i32, i32) {
    %c0_i32 = arith.constant 0 : i32
    %c0_i32_0 = arith.constant 0 : i32
    return %arg1, %c0_i32 : i32, i32
  }
  func.func @transform_3(%arg0: i32, %arg1: i32) -> (i32, i32) {
    %c0_i32 = arith.constant 0 : i32
    %c0_i32_0 = arith.constant 0 : i32
    %c0_i32_1 = arith.constant 0 : i32
    return %c0_i32, %c0_i32_0 : i32, i32
  }
  func.func @transform_4(%arg0: i32, %arg1: i32) -> (i32, i32) {
    %c0_i32 = arith.constant 0 : i32
    %c0_i32_0 = arith.constant 0 : i32
    %c0_i32_1 = arith.constant 0 : i32
    return %c0_i32, %c0_i32_0 : i32, i32
  }
  func.func @transform_5(%arg0: i32, %arg1: i32) -> (i32, i32) {
    %c0_i32 = arith.constant 0 : i32
    %c0_i32_0 = arith.constant 0 : i32
    %c0_i32_1 = arith.constant 0 : i32
    return %c0_i32, %c0_i32_0 : i32, i32
  }
  func.func @transform_6(%arg0: i32, %arg1: i32) -> (i32, i32) {
    %c0_i32 = arith.constant 0 : i32
    %c0_i32_0 = arith.constant 0 : i32
    return %arg0, %c0_i32 : i32, i32
  }
}

</mosaic_0001>

<bundles_post_ra>
// kernel: multihead_attention.3
= control target key start
LH: loop header
LB: loop body
LE: loop exit
PB: predicated region body
PF: predicated region fallthrough
CT: control target
= control target key end

     0   :  { %s628_s12 = smov 0   ;;  %s630_s13 = smov 0   ;;  %s672_s0 = inlined_call_operand.vmem [shape: bf16[3,16,32], index: 0, kind: input, shape index: {}]   ;;  %s673_s1 = inlined_call_operand.vmem [shape: bf16[3,32,32], index: 1, kind: input, shape index: {}]   ;;  %s674_s2 = inlined_call_operand.vmem [shape: f32[3,1,32], index: 2, kind: input, shape index: {}]   ;;  %s675_s3 = inlined_call_operand.vmem [shape: bf16[3,16,32], index: 3, kind: output, shape index: {}]  }
   0x1   :  { %s632_s14 = smov 0  }
   0x2 LB: > { %s39_s15 = sadd.s32 1, %s601_s13  ;;  %p529_p0 = scmp.ge.s32.totalorder %s605_s14, 1  ;;  %s605_s14 = sphi %s632_s14, %s13_s14   ;;  %s601_s13 = sphi %s630_s13, %s677_s13   ;;  %s597_s12 = sphi %s628_s12, %s676_s12  }
   0x3   : > { %p41_p1 = scmp.ge.s32.totalorder %s39_s15, 3  ;;  %p214_p2 = scmp.lt.s32.totalorder %s605_s14, 4 }
   0x5   : > { %s679_s15 = smov (%p41_p1, %s39_s15), 0  ;;  %p215_p3 = pnand %p529_p0, %p214_p2 }
   0x6   : > { %p271_p4 = scmp.lt.s32.totalorder (!%p215_p3), %s597_s12, 2 }
   0x7   : > { %218 = sbr.rel (%p215_p3) target bundleno = 172 (0xac), region = 32 }
   0xc   : > { %vm320_vm0 = vcmask 261120   ;;  %v607_v0 = vmov 0.0   ;;  %s681_s12 = smov (!%p271_p4, %s597_s12), 2  ;;  %vm383_vm1 = vcmask 257024  }
   0xd   : > { %321 = vst.msk [vmem:[#allocation2] sm:$0xff] %vm320_vm0, %v607_v0  ;;  %s552_s16 = sshll.u32 %s681_s12, 4  ;;  %s301_s19 = scalar_lea.vmem %s674_s2, %s681_s12 }
   0xe   : > { %322 = vst.msk [vmem:[#allocation2 + $0x8] sm:$0xff] %vm320_vm0, %v607_v0  ;;  %s294_s22 = scalar_lea.vmem %s673_s1, %s552_s16  ;;  %s551_s23 = sshll.u32 %s681_s12, 3  ;;  %v582_v8 = vld [vmem:[%s301_s19] ss:$0 sm:$0xff] }
   0xf   : > { %v556_v1 = vld [vmem:[%s294_s22 + $0x8] sm:$0xff]  ;;  %v555_v2 = vld [vmem:[%s294_s22] sm:$0xff]  ;;  %s281_s26 = scalar_lea.vmem %s672_s0, %s551_s23  ;;  %s313_s29 = scalar_lea.vmem %s675_s3, %s551_s23 }
  0x10   : > { %358 = vmatpush.bf16.msra.mxu0 %v556_v1  ;;  %v554_v3 = vld [vmem:[%s281_s26] sm:$0xff] }
  0x14   : > { %359 = vmatpush.bf16.msra.mxu0 %v555_v2  ;;  %v323_v4 = vld [vmem:[#allocation2] sm:$0xff] }
  0x15   : > { %v324_v7 = vld [vmem:[#allocation2 + $0x8] sm:$0xff] }
  0x17   : > { %548 = vmatmul.msk.bf16.vlgmr.msra.gmra.mxu0 %vm320_vm0, %v554_v3 }
  0x94   : > { %v361_v5 = vpop.f32.mrf.mxu0 }
  0x95   : > { %v366_v6 = vadd.f32 %v361_v5, %v323_v4 }
  0x97   : > { %368 = vst.msk [vmem:[#allocation2] sm:$0xff] %vm320_vm0, %v366_v6 }
  0x9c   : > { %v363_v9 = vpop.f32.mrf.mxu0 }
  0x9d   : > { %v367_v10 = vadd.f32 %v363_v9, %v324_v7 }
  0x9e   : > { %v373_v11 = vld [vmem:[#allocation2] sm:$0xff] }
  0x9f   : > { %v379_v12 = vadd.f32 %v582_v8, %v373_v11  ;;  %369 = vst.msk [vmem:[#allocation2 + $0x8] sm:$0xff] %vm320_vm0, %v367_v10 }
  0xa1   : > { %v381_v13 = vpack.c.bf16 %v379_v12, %v379_v12 }
  0xa3   : > { %384 = vst.msk [vmem:[%s313_s29] sm:$0xf] %vm383_vm1, %v381_v13 }
  0xa6   : > { %v374_v14 = vld [vmem:[#allocation2 + $0x8] sm:$0xff] }
  0xa7   : > { %v380_v15 = vadd.f32 %v582_v8, %v374_v14 }
  0xa9   : > { %v382_v16 = vpack.c.bf16 %v380_v15, %v380_v15 }
  0xab   : > { %385 = vst.msk [vmem:[%s313_s29 + $0x4] sm:$0xf] %vm383_vm1, %v382_v16 }
  0xac PF: > { %s13_s14 = sadd.s32 1, %s605_s14   ;;  %s676_s12 = smov %s601_s13 }
  0xad   : > { %p10_p5 = scmp.ge.s32.totalorder %s13_s14, 5   ;;  %s677_s13 = smov %s679_s15 }
  0xaf   :  { %12 = sbr.rel (!%p10_p5) target bundleno = 2 (0x2), region = 76 }

// kernel: multihead_attention.4
= control target key start
LH: loop header
LB: loop body
LE: loop exit
PB: predicated region body
PF: predicated region fallthrough
CT: control target
= control target key end

     0   :  { %s842_s12 = smov 0   ;;  %s969_s0 = inlined_call_operand.vmem [shape: bf16[16,8,4], index: 0, kind: input, shape index: {}]   ;;  %s970_s1 = inlined_call_operand.vmem [shape: bf16[16,8,4], index: 1, kind: input, shape index: {}]   ;;  %s971_s2 = inlined_call_operand.vmem [shape: bf16[16,8,4], index: 2, kind: input, shape index: {}]   ;;  %s972_s3 = inlined_call_operand.vmem [shape: bf16[16,8,4], index: 3, kind: output, shape index: {}]  }
   0x1 LB: > { %s743_s13 = sadd.s32 4294967295, %s820_s12   ;;  %p747_p0 = scmp.ge.s32.totalorder %s820_s12, 1  ;;  %s820_s12 = sphi %s842_s12, %s13_s12  }
   0x2   : > { %p160_p1 = scmp.lt.s32.totalorder %s820_s12, 3 }
   0x4   : > { %p161_p2 = pnand %p747_p0, %p160_p1 }
   0x5   : > { %s748_s14 = sshll.u32 (!%p161_p2), %s743_s13, 3 }
   0x6   : > { %164 = sbr.rel (%p161_p2) target bundleno = 579 (0x243), region = 32  ;;  %p195_p3 = scmp.lt.s32.totalorder (!%p161_p2), %s748_s14, 15 }
   0xb   : > { %s974_s14 = smov (!%p195_p3, %s748_s14), 15  ;;  %vm235_vm0 = vcmask 31744   ;;  %vm388_vm1 = vcmask 64512   ;;  %vm496_vm2 = vcmask 1043456   ;;  %vm654_vm3 = vcmask 27648  }
   0xc   : > { %s850_s15 = sshll.u32 %s974_s14, 2 }
   0xd   : > { %s204_s18 = scalar_lea.vmem %s970_s1, %s850_s15  ;;  %s198_s21 = scalar_lea.vmem %s969_s0, %s850_s15 }
   0xe   : > { %v227_v0 = vld [vmem:[%s204_s18] sm:$0xf]  ;;  %v228_v1 = vld [vmem:[%s204_s18 + $0x4] sm:$0xf]  ;;  %v229_v2 = vld [vmem:[%s204_s18 + $0x8] sm:$0xf]  ;;  %s210_s24 = scalar_lea.vmem %s971_s2, %s850_s15  ;;  %s948_s27 = scalar_lea.vmem %s972_s3, %s850_s15 }
   0xf   : > { %v240_v3 = vsel %vm235_vm0, %v227_v0, 0  ;;  %v259_v4 = vsel %vm235_vm0, %v228_v1, 0  ;;  %v278_v5 = vsel %vm235_vm0, %v229_v2, 0  ;;  %v230_v6 = vld [vmem:[%s204_s18 + $0xc] sm:$0xf] }
  0x10   : > { %249 = vmatpush.bf16.xpose.msra.mxu0 %v240_v3  ;;  %268 = vmatpush.bf16.xpose.msra.mxu1 %v259_v4  ;;  %v297_v7 = vsel %vm235_vm0, %v230_v6, 0  ;;  %v233_v8 = vld [vmem:[%s204_s18 + $0x18] sm:$0xf]  ;;  %v234_v10 = vld [vmem:[%s204_s18 + $0x1c] sm:$0xf] }
  0x11   : > { %287 = vmatpush.bf16.xpose.msra.mxu2 %v278_v5  ;;  %306 = vmatpush.bf16.xpose.msra.mxu3 %v297_v7  ;;  %v354_v9 = vsel %vm235_vm0, %v233_v8, 0  ;;  %v232_v11 = vld [vmem:[%s204_s18 + $0x14] sm:$0xf]  ;;  %v373_v12 = vsel %vm235_vm0, %v234_v10, 0  ;;  %v231_v14 = vld [vmem:[%s204_s18 + $0x10] sm:$0xf] }
  0x12   : > { %v335_v13 = vsel %vm235_vm0, %v232_v11, 0  ;;  %v219_v15 = vld [vmem:[%s198_s21] sm:$0xf]  ;;  %v220_v16 = vld [vmem:[%s198_s21 + $0x4] sm:$0xf]  ;;  %v316_v17 = vsel %vm235_vm0, %v231_v14, 0 }
  0x13   : > { %v221_v18 = vld [vmem:[%s198_s21 + $0x8] sm:$0xf]  ;;  %v222_v19 = vld [vmem:[%s198_s21 + $0xc] sm:$0xf]  ;;  %v224_v20 = vld [vmem:[%s198_s21 + $0x14] sm:$0xf] }
  0x14   : > { %v223_v21 = vld [vmem:[%s198_s21 + $0x10] sm:$0xf]  ;;  %v225_v22 = vld [vmem:[%s198_s21 + $0x18] sm:$0xf]  ;;  %v226_v23 = vld [vmem:[%s198_s21 + $0x1c] sm:$0xf] }
  0x17   : > { %756 = vmatmul.msk.bf16.vlgmr.msra.gmra.mxu0 %vm235_vm0, %v219_v15  ;;  %757 = vmatmul.msk.bf16.vlgmr.msra.gmra.mxu1 %vm235_vm0, %v220_v16 }
  0x18   : > { %344 = vmatpush.bf16.xpose.msrb.mxu1 %v335_v13  ;;  %325 = vmatpush.bf16.xpose.msrb.mxu0 %v316_v17 }
  0x19   : > { %363 = vmatpush.bf16.xpose.msrb.mxu2 %v354_v9  ;;  %382 = vmatpush.bf16.xpose.msrb.mxu3 %v373_v12 }
  0x1a   : > { %758 = vmatmul.msk.bf16.vlgmr.msra.gmra.mxu2 %vm235_vm0, %v221_v18  ;;  %759 = vmatmul.msk.bf16.vlgmr.msra.gmra.mxu3 %vm235_vm0, %v222_v19 }
  0x27   : > { %761 = vmatmul.msk.bf16.vlgmr.msrb.gmra.mxu1 %vm235_vm0, %v224_v20  ;;  %760 = vmatmul.msk.bf16.vlgmr.msrb.gmra.mxu0 %vm235_vm0, %v223_v21 }
  0x2a   : > { %762 = vmatmul.msk.bf16.vlgmr.msrb.gmra.mxu2 %vm235_vm0, %v225_v22  ;;  %763 = vmatmul.msk.bf16.vlgmr.msrb.gmra.mxu3 %vm235_vm0, %v226_v23 }
  0x94   : > { %v251_v24 = vpop.f32.mrf.mxu0  ;;  %v270_v25 = vpop.f32.mrf.mxu1 }
  0x95   : > { %v389_v26 = vsel %vm388_vm1, %v251_v24, -inf  ;;  %v392_v29 = vsel %vm388_vm1, %v270_v25, -inf }
  0x96   : > { %390 = vmax.xlane.f32.xlu1 %v389_v26  ;;  %v487_v26 = vld [vmem:[%s210_s24 + $0x8] sm:$0xf] }
  0x9c   : > { %v272_v31 = vpop.f32.mrf.mxu1  ;;  %v253_v32 = vpop.f32.mrf.mxu0 }
  0x9d   : > { %v289_v27 = vpop.f32.mrf.mxu2  ;;  %v308_v28 = vpop.f32.mrf.mxu3  ;;  %v491_v32 = vld [vmem:[%s210_s24 + $0x18] sm:$0xf] }
  0x9e   : > { %v395_v30 = vsel %vm388_vm1, %v289_v27, -inf  ;;  %393 = vmax.xlane.f32.xlu1 %v392_v29  ;;  %v398_v33 = vsel %vm388_vm1, %v308_v28, -inf }
  0x9f   : > { %396 = vmax.xlane.f32.xlu0 %v395_v30  ;;  %v486_v30 = vld [vmem:[%s210_s24 + $0x4] sm:$0xf] }
  0xa0   : > { %v517_v31 = vsel %vm496_vm2, %v486_v30, 0 }
  0xa1   : > { %526 = vmatpush.bf16.msra.mxu1 %v517_v31 }
  0xa4   : > { %v346_v36 = vpop.f32.mrf.mxu1  ;;  %v327_v37 = vpop.f32.mrf.mxu0 }
  0xa5   : > { %v291_v34 = vpop.f32.mrf.mxu2  ;;  %v310_v35 = vpop.f32.mrf.mxu3  ;;  %v404_v38 = vsel %vm388_vm1, %v346_v36, -inf  ;;  %v401_v39 = vsel %vm388_vm1, %v327_v37, -inf }
  0xa6   : > { %405 = vmax.xlane.f32.xlu1 %v404_v38  ;;  %v612_v35 = vsel %vm496_vm2, %v491_v32, 0 }
  0xa7   : > { %399 = vmax.xlane.f32.xlu0 %v398_v33  ;;  %v489_v33 = vld [vmem:[%s210_s24 + $0x10] sm:$0xf] }
  0xac   : > { %v329_v43 = vpop.f32.mrf.mxu0  ;;  %v348_v44 = vpop.f32.mrf.mxu1 }
  0xad   : > { %v365_v40 = vpop.f32.mrf.mxu2  ;;  %v384_v41 = vpop.f32.mrf.mxu3 }
  0xae   : > { %v407_v42 = vsel %vm388_vm1, %v365_v40, -inf  ;;  %v410_v45 = vsel %vm388_vm1, %v384_v41, -inf }
  0xaf   : > { %408 = vmax.xlane.f32.xlu2 %v407_v42  ;;  %402 = vmax.xlane.f32.xlu0 %v401_v39 }
  0xb5   : > { %v367_v46 = vpop.f32.mrf.mxu2  ;;  %v386_v47 = vpop.f32.mrf.mxu3 }
  0xb7   : > { %411 = vmax.xlane.f32.xlu2 %v410_v45 }
 0x109   : > { %v391_v48 = vpop.xlane.xlu1 %390 }
 0x10a   : > { %v413_v49 = vsub.f32 %v251_v24, %v391_v48  ;;  %v485_v24 = vld [vmem:[%s210_s24] sm:$0xf] }
 0x10c   : > { %v421_v50 = vmul.f32 1.442695, %v413_v49 }
 0x10e   : > { %782 = vpow2.f32 %v421_v50 }
 0x111   : > { %v394_v53 = vpop.xlane.xlu1 %393 }
 0x112   : > { %v397_v51 = vpop.xlane.xlu0 %396  ;;  %v414_v55 = vsub.f32 %v270_v25, %v394_v53  ;;  %v498_v25 = vsel %vm496_vm2, %v485_v24, 0 }
 0x113   : > { %v415_v52 = vsub.f32 %v289_v27, %v397_v51  ;;  %507 = vmatpush.bf16.msra.mxu0 %v498_v25  ;;  %v536_v27 = vsel %vm496_vm2, %v487_v26, 0 }
 0x114   : > { %v884_v56 = vpop.eup %782  ;;  %v423_v58 = vmul.f32 1.442695, %v414_v55  ;;  %545 = vmatpush.bf16.msra.mxu2 %v536_v27 }
 0x115   : > { %v425_v54 = vmul.f32 1.442695, %v415_v52  ;;  %v437_v57 = vsel %vm388_vm1, %v884_v56, 0.0 }
 0x116   : > { %438 = vadd.xlane.f32.xlu1 %v437_v57 }
 0x117   : > { %784 = vpow2.f32 %v425_v54 }
 0x118   : > { %786 = vpow2.f32 %v423_v58  ;;  %621 = vmatpush.bf16.msrb.mxu2 %v612_v35 }
 0x119   : > { %v406_v0 = vpop.xlane.xlu1 %405 }
 0x11a   : > { %v400_v59 = vpop.xlane.xlu0 %399  ;;  %v418_v7 = vsub.f32 %v346_v36, %v406_v0  ;;  %v574_v36 = vsel %vm496_vm2, %v489_v33, 0 }
 0x11b   : > { %v416_v60 = vsub.f32 %v308_v28, %v400_v59  ;;  %v488_v28 = vld [vmem:[%s210_s24 + $0xc] sm:$0xf]  ;;  %583 = vmatpush.bf16.msrb.mxu0 %v574_v36 }
 0x11c   : > { %v431_v12 = vmul.f32 1.442695, %v418_v7  ;;  %v555_v29 = vsel %vm496_vm2, %v488_v28, 0 }
 0x11d   : > { %v888_v61 = vpop.eup %784  ;;  %v427_v62 = vmul.f32 1.442695, %v416_v60  ;;  %564 = vmatpush.bf16.msra.mxu3 %v555_v29 }
 0x11e   : > { %v443_v63 = vsel %vm388_vm1, %v888_v61, 0.0  ;;  %v892_v3 = vpop.eup %786 }
 0x11f   : > { %788 = vpow2.f32 %v427_v62  ;;  %444 = vadd.xlane.f32.xlu2 %v443_v63  ;;  %v440_v10 = vsel %vm388_vm1, %v892_v3, 0.0 }
 0x122   : > { %v409_v1 = vpop.xlane.xlu2 %408  ;;  %v403_v2 = vpop.xlane.xlu0 %402 }
 0x123   : > { %v419_v4 = vsub.f32 %v365_v40, %v409_v1  ;;  %v417_v5 = vsub.f32 %v327_v37, %v403_v2  ;;  %v492_v37 = vld [vmem:[%s210_s24 + $0x1c] sm:$0xf] }
 0x124   : > { %v631_v38 = vsel %vm496_vm2, %v492_v37, 0 }
 0x125   : > { %v894_v6 = vpop.eup %788  ;;  %v433_v8 = vmul.f32 1.442695, %v419_v4  ;;  %v429_v9 = vmul.f32 1.442695, %v417_v5  ;;  %640 = vmatpush.bf16.msrb.mxu3 %v631_v38 }
 0x126   : > { %v446_v11 = vsel %vm388_vm1, %v894_v6, 0.0 }
 0x127   : > { %790 = vpow2.f32 %v433_v8  ;;  %441 = vadd.xlane.f32.xlu2 %v440_v10  ;;  %447 = vadd.xlane.f32.xlu0 %v446_v11 }
 0x128   : > { %792 = vpow2.f32 %v429_v9 }
 0x129   : > { %794 = vpow2.f32 %v431_v12 }
 0x12a   : > { %v412_v13 = vpop.xlane.xlu2 %411 }
 0x12b   : > { %v420_v14 = vsub.f32 %v384_v41, %v412_v13  ;;  %v490_v41 = vld [vmem:[%s210_s24 + $0x14] sm:$0xf] }
 0x12c   : > { %v593_v43 = vsel %vm496_vm2, %v490_v41, 0 }
 0x12d   : > { %v900_v15 = vpop.eup %790  ;;  %v435_v16 = vmul.f32 1.442695, %v420_v14  ;;  %602 = vmatpush.bf16.msrb.mxu1 %v593_v43 }
 0x12e   : > { %v902_v17 = vpop.eup %792  ;;  %v455_v18 = vsel %vm388_vm1, %v900_v15, 0.0 }
 0x12f   : > { %796 = vpow2.f32 %v435_v16  ;;  %456 = vadd.xlane.f32.xlu0 %v455_v18  ;;  %v449_v19 = vsel %vm388_vm1, %v902_v17, 0.0  ;;  %v908_v20 = vpop.eup %794 }
 0x130   : > { %450 = vadd.xlane.f32.xlu2 %v449_v19  ;;  %v452_v23 = vsel %vm388_vm1, %v908_v20, 0.0 }
 0x135   : > { %v910_v21 = vpop.eup %796 }
 0x136   : > { %v458_v22 = vsel %vm388_vm1, %v910_v21, 0.0 }
 0x137   : > { %459 = vadd.xlane.f32.xlu1 %v458_v22  ;;  %453 = vadd.xlane.f32.xlu0 %v452_v23 }
 0x189   : > { %v439_v34 = vpop.xlane.xlu1 %438 }
 0x18a   : > { %798 = vrcp.f32 %v439_v34 }
 0x190   : > { %v799_v39 = vpop.eup %798 }
 0x191   : > { %v469_v42 = vmul.f32 %v799_v39, %v884_v56 }
 0x192   : > { %v445_v40 = vpop.xlane.xlu2 %444 }
 0x193   : > { %800 = vrcp.f32 %v445_v40  ;;  %v477_v44 = vpack.c.bf16 %v469_v42, %v469_v42 }
 0x195   : > { %764 = vmatmul.msk.bf16.vlgmr.msra.gmra.mxu0 %vm388_vm1, %v477_v44 }
 0x199   : > { %v801_v45 = vpop.eup %800 }
 0x19a   : > { %v471_v46 = vmul.f32 %v801_v45, %v888_v61  ;;  %v442_v47 = vpop.xlane.xlu2 %441  ;;  %v448_v48 = vpop.xlane.xlu0 %447 }
 0x19b   : > { %802 = vrcp.f32 %v442_v47 }
 0x19c   : > { %v479_v49 = vpack.c.bf16 %v471_v46, %v471_v46  ;;  %804 = vrcp.f32 %v448_v48 }
 0x19e   : > { %766 = vmatmul.msk.bf16.vlgmr.msra.gmra.mxu2 %vm388_vm1, %v479_v49 }
 0x1a1   : > { %v803_v50 = vpop.eup %802 }
 0x1a2   : > { %v805_v51 = vpop.eup %804  ;;  %v470_v52 = vmul.f32 %v803_v50, %v892_v3  ;;  %v457_v53 = vpop.xlane.xlu0 %456 }
 0x1a3   : > { %v472_v54 = vmul.f32 %v805_v51, %v894_v6  ;;  %v451_v55 = vpop.xlane.xlu2 %450  ;;  %806 = vrcp.f32 %v457_v53 }
 0x1a4   : > { %v478_v56 = vpack.c.bf16 %v470_v52, %v470_v52  ;;  %808 = vrcp.f32 %v451_v55 }
 0x1a5   : > { %v480_v57 = vpack.c.bf16 %v472_v54, %v472_v54 }
 0x1a6   : > { %765 = vmatmul.msk.bf16.vlgmr.msra.gmra.mxu1 %vm388_vm1, %v478_v56 }
 0x1a7   : > { %767 = vmatmul.msk.bf16.vlgmr.msra.gmra.mxu3 %vm388_vm1, %v480_v57 }
 0x1a9   : > { %v807_v58 = vpop.eup %806 }
 0x1aa   : > { %v809_v59 = vpop.eup %808  ;;  %v475_v60 = vmul.f32 %v807_v58, %v900_v15  ;;  %v460_v61 = vpop.xlane.xlu1 %459 }
 0x1ab   : > { %v454_v62 = vpop.xlane.xlu0 %453  ;;  %v473_v63 = vmul.f32 %v809_v59, %v902_v17  ;;  %810 = vrcp.f32 %v460_v61 }
 0x1ac   : > { %v483_v0 = vpack.c.bf16 %v475_v60, %v475_v60  ;;  %812 = vrcp.f32 %v454_v62 }
 0x1ad   : > { %v481_v1 = vpack.c.bf16 %v473_v63, %v473_v63 }
 0x1ae   : > { %770 = vmatmul.msk.bf16.vlgmr.msrb.gmra.mxu2 %vm388_vm1, %v483_v0 }
 0x1af   : > { %768 = vmatmul.msk.bf16.vlgmr.msrb.gmra.mxu0 %vm388_vm1, %v481_v1 }
 0x1b1   : > { %v811_v2 = vpop.eup %810 }
 0x1b2   : > { %v813_v3 = vpop.eup %812  ;;  %v476_v4 = vmul.f32 %v811_v2, %v910_v21 }
 0x1b3   : > { %v474_v5 = vmul.f32 %v813_v3, %v908_v20 }
 0x1b4   : > { %v484_v6 = vpack.c.bf16 %v476_v4, %v476_v4 }
 0x1b5   : > { %v482_v7 = vpack.c.bf16 %v474_v5, %v474_v5 }
 0x1b7   : > { %769 = vmatmul.msk.bf16.vlgmr.msrb.gmra.mxu1 %vm388_vm1, %v482_v7  ;;  %771 = vmatmul.msk.bf16.vlgmr.msrb.gmra.mxu3 %vm388_vm1, %v484_v6 }
 0x212   : > { %v509_v8 = vpop.f32.mrf.mxu0 }
 0x213   : > { %v646_v9 = vpack.c.bf16 %v509_v8, %v509_v8 }
 0x215   : > { %655 = vst.msk [vmem:[%s948_s27] sm:$0xf] %vm654_vm3, %v646_v9 }
 0x21a   : > { %v511_v10 = vpop.f32.mrf.mxu0 }
 0x221   : > { %v547_v11 = vpop.f32.mrf.mxu2 }
 0x222   : > { %v648_v12 = vpack.c.bf16 %v547_v11, %v547_v11 }
 0x223   : > { %v528_v13 = vpop.f32.mrf.mxu1 }
 0x224   : > { %657 = vst.msk [vmem:[%s948_s27 + $0x8] sm:$0xf] %vm654_vm3, %v648_v12  ;;  %v647_v14 = vpack.c.bf16 %v528_v13, %v528_v13 }
 0x226   : > { %656 = vst.msk [vmem:[%s948_s27 + $0x4] sm:$0xf] %vm654_vm3, %v647_v14 }
 0x229   : > { %v549_v15 = vpop.f32.mrf.mxu2 }
 0x22a   : > { %v566_v16 = vpop.f32.mrf.mxu3 }
 0x22b   : > { %v649_v17 = vpack.c.bf16 %v566_v16, %v566_v16  ;;  %v530_v18 = vpop.f32.mrf.mxu1 }
 0x22c   : > { %v585_v19 = vpop.f32.mrf.mxu0 }
 0x22d   : > { %658 = vst.msk [vmem:[%s948_s27 + $0xc] sm:$0xf] %vm654_vm3, %v649_v17  ;;  %v650_v20 = vpack.c.bf16 %v585_v19, %v585_v19 }
 0x22f   : > { %659 = vst.msk [vmem:[%s948_s27 + $0x10] sm:$0xf] %vm654_vm3, %v650_v20 }
 0x231   : > { %v623_v21 = vpop.f32.mrf.mxu2 }
 0x232   : > { %v568_v22 = vpop.f32.mrf.mxu3  ;;  %v652_v23 = vpack.c.bf16 %v623_v21, %v623_v21 }
 0x234   : > { %661 = vst.msk [vmem:[%s948_s27 + $0x18] sm:$0xf] %vm654_vm3, %v652_v23  ;;  %v587_v24 = vpop.f32.mrf.mxu0  ;;  %v604_v25 = vpop.f32.mrf.mxu1 }
 0x235   : > { %v651_v26 = vpack.c.bf16 %v604_v25, %v604_v25 }
 0x237   : > { %660 = vst.msk [vmem:[%s948_s27 + $0x14] sm:$0xf] %vm654_vm3, %v651_v26 }
 0x239   : > { %v625_v27 = vpop.f32.mrf.mxu2 }
 0x23a   : > { %v642_v28 = vpop.f32.mrf.mxu3 }
 0x23b   : > { %v653_v29 = vpack.c.bf16 %v642_v28, %v642_v28 }
 0x23c   : > { %v606_v30 = vpop.f32.mrf.mxu1 }
 0x23d   : > { %662 = vst.msk [vmem:[%s948_s27 + $0x1c] sm:$0xf] %vm654_vm3, %v653_v29 }
 0x242   : > { %v644_v31 = vpop.f32.mrf.mxu3 }
 0x243 PF: > { %s13_s12 = sadd.s32 1, %s820_s12  }
 0x244   : > { %p10_p4 = scmp.ge.s32.totalorder %s13_s12, 4  }
 0x246   :  { %12 = sbr.rel (!%p10_p4) target bundleno = 1 (0x1), region = 68 }

// kernel: multihead_attention.5
= control target key start
LH: loop header
LB: loop body
LE: loop exit
PB: predicated region body
PF: predicated region fallthrough
CT: control target
= control target key end

     0   :  { %vm29_vm0 = vcmask 261120   ;;  %v233_v1 = vmov 0.0   ;;  %s311_s0 = inlined_call_operand.vmem [shape: bf16[16,32], index: 0, kind: input, shape index: {}]   ;;  %s312_s1 = inlined_call_operand.vmem [shape: f32[16,32], index: 1, kind: input, shape index: {}]   ;;  %s313_s2 = inlined_call_operand.vmem [shape: bf16[32,32], index: 2, kind: input, shape index: {}]   ;;  %s314_s3 = inlined_call_operand.vmem [shape: f32[1,32], index: 3, kind: input, shape index: {}]   ;;  %s315_s4 = inlined_call_operand.vmem [shape: f32[1,32], index: 4, kind: input, shape index: {}]   ;;  %s316_s5 = inlined_call_operand.vmem [shape: f32[1,32], index: 5, kind: input, shape index: {}]   ;;  %s317_s6 = inlined_call_operand.hbm [shape: f32[16,32], index: 6, kind: output, shape index: {}]  }
   0x1   :  { %v192_v0 = vld [vmem:[%s313_s2 + $0x8] sm:$0xff]  ;;  %30 = vst.msk [vmem:[#allocation2] sm:$0xff] %vm29_vm0, %v233_v1  ;;  %v191_v2 = vld [vmem:[%s313_s2] sm:$0xff] }
   0x2   :  { %67 = vmatpush.bf16.msra.mxu0 %v192_v0  ;;  %31 = vst.msk [vmem:[#allocation2 + $0x8] sm:$0xff] %vm29_vm0, %v233_v1 }
   0x3   :  { %11 = vsyncpa [#allocation4], 0  ;;  %v190_v3 = vld [vmem:[%s311_s0] sm:$0xff]  ;;  %v91_v17 = vld [vmem:[%s312_s1 + $0x8] sm:$0xff]  ;;  %v234_v21 = vmov 32.0   ;;  %s165_s12 = sshll.u32 %s317_s6, 4  ;;  %s166_s12 = int_to_ptr.hbm [resolvable:$true] %s165_s12 }
   0x4   :  { %v198_v8 = vld [vmem:[%s314_s3] ss:$0 sm:$0xff]  ;;  %201 = vrcp.f32 %v234_v21  ;;  %s237_s13 = smov 8  }
   0x5   :  { %v90_v12 = vld [vmem:[%s312_s1] sm:$0xff] }
   0x6   :  { %68 = vmatpush.bf16.msra.mxu0 %v191_v2  ;;  %v199_v52 = vld [vmem:[%s315_s4] ss:$0 sm:$0xff]  ;;  %s235_s4 = smov [#allocation3]  }
   0x7   :  { %v200_v56 = vld [vmem:[%s316_s5] ss:$0 sm:$0xff]  ;;  %s163_s9 = sshll.u32 %s235_s4, 4  ;;  %s236_s5 = smov 128   ;;  %s164_s9 = int_to_ptr.vmem [resolvable:$true] %s163_s9 }
   0x8   :  { %v32_v4 = vld [vmem:[#allocation2] sm:$0xff] }
   0x9   :  { %189 = vmatmul.msk.bf16.vlgmr.msra.gmra.mxu0 %vm29_vm0, %v190_v3  ;;  %v33_v7 = vld [vmem:[#allocation2 + $0x8] sm:$0xff] }
   0xa   :  { %v202_v22 = vpop.eup %201 }
   0xb   :  { %v101_v23 = vmul.f32 32.0, %v202_v22  ;;  %vm105_vm1 = vweird.f32 %v202_v22 }
   0xd   :  { %v102_v24 = vsub.f32 1.0, %v101_v23 }
   0xf   :  { %v103_v25 = vmul.f32 %v202_v22, %v102_v24 }
  0x11   :  { %v104_v26 = vadd.f32 %v202_v22, %v103_v25 }
  0x13   :  { %v106_v27 = vsel %vm105_vm1, %v202_v22, %v104_v26 }
  0x86   :  { %v70_v5 = vpop.f32.mrf.mxu0 }
  0x87   :  { %v75_v6 = vadd.f32 %v70_v5, %v32_v4 }
  0x89   :  { %77 = vst.msk [vmem:[#allocation2] sm:$0xff] %vm29_vm0, %v75_v6 }
  0x8e   :  { %v72_v9 = vpop.f32.mrf.mxu0 }
  0x8f   :  { %v76_v10 = vadd.f32 %v72_v9, %v33_v7 }
  0x90   :  { %v82_v11 = vld [vmem:[#allocation2] sm:$0xff] }
  0x91   :  { %78 = vst.msk [vmem:[#allocation2 + $0x8] sm:$0xff] %vm29_vm0, %v76_v10  ;;  %v88_v13 = vadd.f32 %v198_v8, %v82_v11 }
  0x93   :  { %v92_v14 = vadd.f32 %v90_v12, %v88_v13 }
  0x95   :  { %v94_v15 = vsel %vm29_vm0, %v92_v14, 0.0 }
  0x96   :  { %95 = vadd.xlane.f32.xlu0 %v94_v15 }
  0x98   :  { %v83_v16 = vld [vmem:[#allocation2 + $0x8] sm:$0xff] }
  0x99   :  { %v89_v18 = vadd.f32 %v198_v8, %v83_v16 }
  0x9b   :  { %v93_v19 = vadd.f32 %v91_v17, %v89_v18 }
  0x9d   :  { %v97_v20 = vsel %vm29_vm0, %v93_v19, 0.0 }
  0x9e   :  { %98 = vadd.xlane.f32.xlu0 %v97_v20 }
 0x109   :  { %v96_v28 = vpop.xlane.xlu0 %95 }
 0x10a   :  { %v107_v29 = vmul.f32 %v106_v27, %v96_v28 }
 0x10c   :  { %v109_v30 = vsub.f32 %v92_v14, %v107_v29 }
 0x10e   :  { %v111_v31 = vmul.f32 %v109_v30, %v109_v30 }
 0x110   :  { %v113_v32 = vsel %vm29_vm0, %v111_v31, 0.0 }
 0x111   :  { %114 = vadd.xlane.f32.xlu1 %v113_v32  ;;  %v99_v33 = vpop.xlane.xlu0 %98 }
 0x112   :  { %v108_v34 = vmul.f32 %v106_v27, %v99_v33 }
 0x114   :  { %v110_v35 = vsub.f32 %v93_v19, %v108_v34 }
 0x116   :  { %v112_v36 = vmul.f32 %v110_v35, %v110_v35 }
 0x118   :  { %v116_v37 = vsel %vm29_vm0, %v112_v36, 0.0 }
 0x119   :  { %117 = vadd.xlane.f32.xlu1 %v116_v37 }
 0x184   :  { %v115_v38 = vpop.xlane.xlu1 %114 }
 0x185   :  { %v119_v39 = vmul.f32 %v115_v38, %v106_v27 }
 0x187   :  { %v121_v40 = vadd.f32 1e-05, %v119_v39 }
 0x189   :  { %203 = vrsqrt.f32 %v121_v40  ;;  %vm129_vm3 = vweird.f32 %v121_v40 }
 0x18c   :  { %v118_v41 = vpop.xlane.xlu1 %117 }
 0x18d   :  { %v120_v42 = vmul.f32 %v118_v41, %v106_v27 }
 0x18f   :  { %v204_v43 = vpop.eup %203  ;;  %v122_v44 = vadd.f32 1e-05, %v120_v42 }
 0x190   :  { %v124_v45 = vmul.f32 %v204_v43, %v121_v40  ;;  %vm130_vm2 = vweird.f32 %v204_v43 }
 0x191   :  { %205 = vrsqrt.f32 %v122_v44  ;;  %vm131_vm4 = vmor %vm129_vm3, %vm130_vm2  ;;  %vm139_vm6 = vweird.f32 %v122_v44 }
 0x192   :  { %v125_v46 = vmul.f32 %v204_v43, %v124_v45 }
 0x194   :  { %v126_v47 = vmul.f32 0.5, %v125_v46 }
 0x196   :  { %v127_v48 = vsub.f32 1.5, %v126_v47 }
 0x197   :  { %v206_v49 = vpop.eup %205 }
 0x198   :  { %v128_v50 = vmul.f32 %v204_v43, %v127_v48  ;;  %v134_v51 = vmul.f32 %v206_v49, %v122_v44  ;;  %vm140_vm5 = vweird.f32 %v206_v49 }
 0x199   :  { %vm141_vm7 = vmor %vm139_vm6, %vm140_vm5 }
 0x19a   :  { %v132_v53 = vsel %vm131_vm4, %v204_v43, %v128_v50  ;;  %v135_v54 = vmul.f32 %v206_v49, %v134_v51 }
 0x19b   :  { %v143_v55 = vmul.f32 %v132_v53, %v109_v30 }
 0x19c   :  { %v136_v57 = vmul.f32 0.5, %v135_v54 }
 0x19d   :  { %v149_v58 = vmul.f32 %v199_v52, %v143_v55 }
 0x19e   :  { %v137_v59 = vsub.f32 1.5, %v136_v57 }
 0x19f   :  { %v155_v60 = vadd.f32 %v200_v56, %v149_v58 }
 0x1a0   :  { %v138_v61 = vmul.f32 %v206_v49, %v137_v59 }
 0x1a1   :  { %157 = vst.msk [vmem:[#allocation3] sm:$0xff] %vm29_vm0, %v155_v60 }
 0x1a2   :  { %v142_v62 = vsel %vm141_vm7, %v206_v49, %v138_v61 }
 0x1a3   :  { %v144_v63 = vmul.f32 %v142_v62, %v110_v35 }
 0x1a5   :  { %v150_v0 = vmul.f32 %v199_v52, %v144_v63 }
 0x1a7   :  { %v156_v1 = vadd.f32 %v200_v56, %v150_v0 }
 0x1a9   :  { %158 = vst.msk [vmem:[#allocation3 + $0x8] sm:$0xff] %vm29_vm0, %v156_v1 }
 0x1aa   :  { %171 = dma.vmem_to_hbm [thread:$0]  %s164_s9, 256, %s166_s12, [#allocation4], %s236_s5, %s236_s5, %s237_s13  }
 0x1ab   :  { %231 = dma.done.wait [#allocation4], 256  }
 0x1ac   :  { %232 = vsyncadd [#allocation4], 4294967040 }
 0x1ad   :  { %176 = vsyncpa [#allocation4], 1 }

</bundles_post_ra>
